<compile_context>
chip_gen: v7x
topology: tpu7x:2x2x1
jax: 0.10.0
libtpu: 0.0.40
codegen_flags: <defaults>
</compile_context>

<pallas_src>
import functools

import jax
import jax.numpy as jnp
from jax import lax
from jax.experimental import pallas as pl
from jax.experimental.pallas import tpu as pltpu

_LANE = 128


def _make_mse_kernel(rows_total, block_rows, nsteps, needs_mask):
    """Kernel over lane-dense (block_rows, 128) blocks of the flattened input.

    Lane parity encodes the column (even lane = col 0, odd lane = col 1) since
    the original (N, 2) array is row-major and 128 is even.

    acc_ref : (1, 128) f32 VMEM vector accumulator (per core / per split).
    sums_ref: (1, 2)   f32 SMEM output block: [col0_sum, col1_sum].
    """

    def kernel(o_ref, t_ref, sums_ref, acc_ref):
        step = pl.program_id(1)

        @pl.when(step == 0)
        def _init():
            acc_ref[...] = jnp.zeros_like(acc_ref)

        d = o_ref[...].astype(jnp.float32) - t_ref[...].astype(jnp.float32)
        sq = d * d

        if needs_mask:
            # Only the last (possibly duplicated/clamped) block can contain
            # rows >= rows_total; zero them before accumulation.
            logical_blk = pl.program_id(0) * nsteps + step
            row = logical_blk * block_rows + lax.broadcasted_iota(
                jnp.int32, sq.shape, 0)
            sq = jnp.where(row < rows_total, sq, 0.0)

        # Sublane reduction -> (1, 128); pure vreg adds riding the VPU slot.
        acc_ref[...] += jnp.sum(sq, axis=0, keepdims=True)

        @pl.when(step == nsteps - 1)
        def _finalize():
            acc = acc_ref[...]
            lane = lax.broadcasted_iota(jnp.int32, acc.shape, 1)
            s0 = jnp.sum(jnp.where((lane % 2) == 0, acc, 0.0))
            s_all = jnp.sum(acc)
            sums_ref[0, 0] = s0          # column 0 (linear) sum of sq errors
            sums_ref[0, 1] = s_all - s0  # column 1 (angular) sum of sq errors

    return kernel


def _mse_ref(output, target):
    """Pure-jnp fallback (tiny batches / C != 2); also the correctness oracle."""
    o = output.astype(jnp.float32)
    t = target.astype(jnp.float32)
    sq = (o - t) ** 2
    return jnp.mean(sq), jnp.mean(sq[:, 0]), jnp.mean(sq[:, 1])


@functools.partial(
    jax.jit, static_argnames=("min_batch_for_pallas", "block_rows", "num_splits")
)
def mse_loss(output, target, *, min_batch_for_pallas=1024, block_rows=4096,
             num_splits=2):
    """Returns (loss, loss_linear, loss_angular) exactly like the torch module."""
    assert output.shape == target.shape
    assert output.ndim == 2 and output.shape[1] >= 2
    assert block_rows >= 8 and block_rows % 8 == 0
    n, c = output.shape

    # The lane-parity column trick relies on exactly 2 interleaved columns
    # (which is what the module's forward implies).  Tiny batches bypass Pallas.
    if c != 2 or n < max(1, min_batch_for_pallas):
        return _mse_ref(output, target)

    total = n * c
    flat_o = output.reshape(total)   # free: contiguous row-major reinterpret
    flat_t = target.reshape(total)   # dtype preserved (no wrapper upcast)
    rem = total % _LANE
    if rem:
        # Only when N % 64 != 0: pad < 128 zeros so the (rows, 128) reshape is
        # exact; identical zero padding contributes 0 to every squared error.
        pad = _LANE - rem
        flat_o = jnp.pad(flat_o, (0, pad))
        flat_t = jnp.pad(flat_t, (0, pad))
    rows_total = flat_o.shape[0] // _LANE
    o2 = flat_o.reshape(rows_total, _LANE)
    t2 = flat_t.reshape(rows_total, _LANE)

    # Block: (br, 128).  br is a multiple of 8, or the full (small) row extent.
    br = block_rows if rows_total >= block_rows else rows_total
    num_blocks = pl.cdiv(rows_total, br)
    splits = max(1, min(num_splits, num_blocks))   # v7x: one split per core
    nsteps = pl.cdiv(num_blocks, splits)
    needs_mask = (splits * nsteps * br) != rows_total

    if splits * nsteps == num_blocks:
        def in_map(s, i):
            return (s * nsteps + i, 0)
    else:
        # Clamp logical block indices past the end onto the last real block;
        # the kernel row-mask zeroes the duplicated data.
        def in_map(s, i):
            return (jnp.minimum(s * nsteps + i, num_blocks - 1), 0)

    kernel = _make_mse_kernel(rows_total, br, nsteps, needs_mask)
    itemsize = jnp.dtype(output.dtype).itemsize

    partials = pl.pallas_call(
        kernel,
        out_shape=jax.ShapeDtypeStruct((splits, 2), jnp.float32),
        grid_spec=pltpu.PrefetchScalarGridSpec(
            num_scalar_prefetch=0,
            grid=(splits, nsteps),
            in_specs=[
                pl.BlockSpec((br, _LANE), in_map),
                pl.BlockSpec((br, _LANE), in_map),
            ],
            out_specs=pl.BlockSpec(
                (1, 2), lambda s, i: (s, 0),
                memory_space=pltpu.MemorySpace.SMEM),
            scratch_shapes=[pltpu.VMEM((1, _LANE), jnp.float32)],
        ),
        compiler_params=pltpu.CompilerParams(
            dimension_semantics=("parallel", "arbitrary"),
        ),
        cost_estimate=pl.CostEstimate(
            flops=3 * total,
            transcendentals=0,
            bytes_accessed=2 * total * itemsize + splits * 2 * 4,
        ),
    )(o2, t2)

    sums = jnp.sum(partials, axis=0)            # combine per-core partials
    n_f = jnp.float32(n)
    loss_linear = sums[0] / n_f
    loss_angular = sums[1] / n_f
    loss = (sums[0] + sums[1]) / (2.0 * n_f)    # mean over all N*2 elements
    return loss, loss_linear, loss_angular


def _check(got, want, name):
    for g, w, tag in zip(got, want, ("loss", "loss_linear", "loss_angular")):
        assert jnp.allclose(g, w, rtol=1e-4, atol=1e-6), (
            f"{name}/{tag}: got {g}, want {w}"
        )


if __name__ == "__main__":
    key = jax.random.PRNGKey(0)
    k1, k2, k3, k4, k5, k6 = jax.random.split(key, 6)

    # Case 1: tiny (batch, 2) input exactly as the module's forward implies.
    # Force the Pallas path (default would bypass to fused jnp at this size).
    out_s = jax.random.normal(k1, (16, 2), dtype=jnp.float32)
    tgt_s = jax.random.normal(k2, (16, 2), dtype=jnp.float32)
    res_s = jax.block_until_ready(mse_loss(out_s, tgt_s, min_batch_for_pallas=0))
    _check(res_s, _mse_ref(out_s, tgt_s), "small")

    # Case 2: ragged batch (700 rows -> 11 lane-rows) exercising the two-way
    # core split and the masked last block (block_rows=8 -> 2 blocks, 1/split).
    out_m = jax.random.normal(k3, (700, 2), dtype=jnp.float32)
    tgt_m = jax.random.normal(k4, (700, 2), dtype=jnp.float32)
    res_m = jax.block_until_ready(
        mse_loss(out_m, tgt_m, min_batch_for_pallas=0, block_rows=8))
    _check(res_m, _mse_ref(out_m, tgt_m), "ragged")

    # Case 3: bf16 inputs pass through un-upcast (half the DMA bytes); batch is
    # a multiple of 64 -> zero-copy reshape, single full-extent block.
    out_b = jax.random.normal(k5, (4096, 2), dtype=jnp.bfloat16)
    tgt_b = jax.random.normal(k6, (4096, 2), dtype=jnp.bfloat16)
    res_b = jax.block_until_ready(mse_loss(out_b, tgt_b, min_batch_for_pallas=0))
    _check(res_b, _mse_ref(out_b, tgt_b), "bf16")

    print("KERNEL_OK")
</pallas_src>

<mosaic_0001>
module attributes {stable_mosaic.version = 11 : i64} {
  func.func @kernel(%arg0: i32, %arg1: i32, %arg2: memref<1x128xf32, #tpu.memory_space<vmem>>, %arg3: memref<1x128xf32, #tpu.memory_space<vmem>>, %arg4: memref<1x2xf32, #tpu.memory_space<smem>>, %arg5: memref<1x128xf32, #tpu.memory_space<vmem>>) attributes {dimension_semantics = [#tpu.dimension_semantics<parallel>, #tpu.dimension_semantics<arbitrary>], iteration_bounds = array<i64: 1, 1>, scalar_prefetch = 0 : i64, scratch_operands = 1 : i64, tpu.core_type = #tpu.core_type<tc>, window_params = [{transform_indices = @transform_0, window_bounds = array<i64: 1, 128>}, {transform_indices = @transform_1, window_bounds = array<i64: 1, 128>}, {transform_indices = @transform_2, window_bounds = array<i64: 1, 2>}]} {
    %c0_i32 = arith.constant 0 : i32
    %0 = arith.cmpi eq, %arg1, %c0_i32 : i32
    %1 = arith.extui %0 : i1 to i32
    %c0_i32_0 = arith.constant 0 : i32
    %2 = arith.cmpi ne, %1, %c0_i32_0 : i32
    scf.if %2 {
      %cst_10 = arith.constant 0.000000e+00 : f32
      %15 = vector.broadcast %cst_10 : f32 to vector<1x128xf32>
      %c0_11 = arith.constant 0 : index
      %c0_12 = arith.constant 0 : index
      %16 = vector.load %arg5[%c0_11, %c0_12] : memref<1x128xf32, #tpu.memory_space<vmem>>, vector<1x128xf32>
      tpu.vector_store %arg5[%c0_11, %c0_12], %15 {strides = array<i32>} : memref<1x128xf32, #tpu.memory_space<vmem>>, vector<1x128xf32>,
    } else {
    }
    %c0 = arith.constant 0 : index
    %c0_1 = arith.constant 0 : index
    %3 = vector.load %arg2[%c0, %c0_1] : memref<1x128xf32, #tpu.memory_space<vmem>>, vector<1x128xf32>
    %c0_2 = arith.constant 0 : index
    %c0_3 = arith.constant 0 : index
    %4 = vector.load %arg3[%c0_2, %c0_3] : memref<1x128xf32, #tpu.memory_space<vmem>>, vector<1x128xf32>
    %5 = arith.subf %3, %4 : vector<1x128xf32>
    %6 = arith.mulf %5, %5 : vector<1x128xf32>
    %c0_4 = arith.constant 0 : index
    %c0_5 = arith.constant 0 : index
    %7 = vector.load %arg5[%c0_4, %c0_5] : memref<1x128xf32, #tpu.memory_space<vmem>>, vector<1x128xf32>
    %cst = arith.constant dense<0.000000e+00> : vector<128xf32>
    %8 = vector.multi_reduction <add>, %6, %cst [0] : vector<1x128xf32> to vector<128xf32>
    %9 = vector.shape_cast %8 : vector<128xf32> to vector<1x128xf32>
    %10 = arith.addf %7, %9 : vector<1x128xf32>
    %c0_6 = arith.constant 0 : index
    %c0_7 = arith.constant 0 : index
    %11 = vector.load %arg5[%c0_6, %c0_7] : memref<1x128xf32, #tpu.memory_space<vmem>>, vector<1x128xf32>
    tpu.vector_store %arg5[%c0_6, %c0_7], %10 {strides = array<i32>} : memref<1x128xf32, #tpu.memory_space<vmem>>, vector<1x128xf32>,
    %c0_i32_8 = arith.constant 0 : i32
    %12 = arith.cmpi eq, %arg1, %c0_i32_8 : i32
    %13 = arith.extui %12 : i1 to i32
    %c0_i32_9 = arith.constant 0 : i32
    %14 = arith.cmpi ne, %13, %c0_i32_9 : i32
    scf.if %14 {
      %c0_10 = arith.constant 0 : index
      %c0_11 = arith.constant 0 : index
      %15 = vector.load %arg5[%c0_10, %c0_11] : memref<1x128xf32, #tpu.memory_space<vmem>>, vector<1x128xf32>
      %16 = tpu.iota {dimensions = array<i32: 1>} : vector<1x128xi32>
      %c2_i32 = arith.constant 2 : i32
      %c0_i32_12 = arith.constant 0 : i32
      %17 = arith.cmpi eq, %c2_i32, %c0_i32_12 : i32
      %c1_i32 = arith.constant 1 : i32
      %18 = arith.select %17, %c1_i32, %c2_i32 : i32
      %19 = vector.broadcast %18 : i32 to vector<1x128xi32>
      %20 = arith.remsi %16, %19 : vector<1x128xi32>
      %c0_i32_13 = arith.constant 0 : i32
      %21 = vector.broadcast %c0_i32_13 : i32 to vector<1x128xi32>
      %22 = arith.cmpi ne, %20, %21 : vector<1x128xi32>
      %c0_i32_14 = arith.constant 0 : i32
      %23 = vector.broadcast %c0_i32_14 : i32 to vector<1x128xi32>
      %24 = arith.cmpi slt, %20, %23 : vector<1x128xi32>
      %c0_i32_15 = arith.constant 0 : i32
      %25 = arith.cmpi slt, %18, %c0_i32_15 : i32
      %26 = vector.broadcast %25 : i1 to vector<1x128xi1>
      %27 = vector.broadcast %26 : vector<1x128xi1> to vector<1x128xi1>
      %28 = arith.xori %24, %27 : vector<1x128xi1>
      %29 = arith.andi %28, %22 : vector<1x128xi1>
      %30 = vector.broadcast %18 : i32 to vector<1x128xi32>
      %31 = arith.addi %20, %30 : vector<1x128xi32>
      %32 = arith.select %29, %31, %20 : vector<1x128xi1>, vector<1x128xi32>
      %c0_i32_16 = arith.constant 0 : i32
      %33 = vector.broadcast %c0_i32_16 : i32 to vector<1x128xi32>
      %34 = arith.cmpi eq, %32, %33 : vector<1x128xi32>
      %cst_17 = arith.constant 0.000000e+00 : f32
      %35 = vector.broadcast %cst_17 : f32 to vector<1x128xf32>
      %36 = arith.select %34, %15, %35 : vector<1x128xi1>, vector<1x128xf32>
      %37 = vector.shape_cast %36 : vector<1x128xf32> to vector<1x1x128xf32>
      %cst_18 = arith.constant dense<0.000000e+00> : vector<1xf32>
      %38 = vector.multi_reduction <add>, %37, %cst_18 [1, 2] : vector<1x1x128xf32> to vector<1xf32>
      %39 = vector.shape_cast %38 : vector<1xf32> to vector<1x1x1xf32>
      %40 = vector.extract %39[0, 0, 0] : f32 from vector<1x1x1xf32>
      %41 = vector.shape_cast %15 : vector<1x128xf32> to vector<1x1x128xf32>
      %cst_19 = arith.constant dense<0.000000e+00> : vector<1xf32>
      %42 = vector.multi_reduction <add>, %41, %cst_19 [1, 2] : vector<1x1x128xf32> to vector<1xf32>
      %43 = vector.shape_cast %42 : vector<1xf32> to vector<1x1x1xf32>
      %44 = vector.extract %43[0, 0, 0] : f32 from vector<1x1x1xf32>
      %c0_20 = arith.constant 0 : index
      %c0_21 = arith.constant 0 : index
      %45 = memref.load %arg4[%c0_20, %c0_21] : memref<1x2xf32, #tpu.memory_space<smem>>
      memref.store %40, %arg4[%c0_20, %c0_21] : memref<1x2xf32, #tpu.memory_space<smem>>
      %46 = arith.subf %44, %40 : f32
      %c0_22 = arith.constant 0 : index
      %c1 = arith.constant 1 : index
      %47 = memref.load %arg4[%c0_22, %c1] : memref<1x2xf32, #tpu.memory_space<smem>>
      memref.store %46, %arg4[%c0_22, %c1] : memref<1x2xf32, #tpu.memory_space<smem>>
    } else {
    }
    return
  }
  func.func @transform_0(%arg0: i32, %arg1: i32) -> (i32, i32) {
    %c1_i32 = arith.constant 1 : i32
    %0 = arith.muli %arg0, %c1_i32 : i32
    %1 = arith.addi %0, %arg1 : i32
    %c0_i32 = arith.constant 0 : i32
    %c0_i32_0 = arith.constant 0 : i32
    return %1, %c0_i32 : i32, i32
  }
  func.func @transform_1(%arg0: i32, %arg1: i32) -> (i32, i32) {
    %c1_i32 = arith.constant 1 : i32
    %0 = arith.muli %arg0, %c1_i32 : i32
    %1 = arith.addi %0, %arg1 : i32
    %c0_i32 = arith.constant 0 : i32
    %c0_i32_0 = arith.constant 0 : i32
    return %1, %c0_i32 : i32, i32
  }
  func.func @transform_2(%arg0: i32, %arg1: i32) -> (i32, i32) {
    %c0_i32 = arith.constant 0 : i32
    %c0_i32_0 = arith.constant 0 : i32
    return %arg0, %c0_i32 : i32, i32
  }
}

</mosaic_0001>

<bundles_post_ra>
// kernel: mse_loss.1
= control target key start
LH: loop header
LB: loop body
LE: loop exit
PB: predicated region body
PF: predicated region fallthrough
CT: control target
= control target key end

     0   :  { %v140_v2 = vmov 0.0   ;;  %s166_s0 = inlined_call_operand.vmem [shape: f32[1,128], index: 0, kind: input, shape index: {}]   ;;  %s167_s1 = inlined_call_operand.vmem [shape: f32[1,128], index: 1, kind: input, shape index: {}]   ;;  %s168_s2 = inlined_call_operand.vmem [shape: f32[1,2], index: 2, kind: output, shape index: {}]  }
   0x1   :  { %v45_v0 = vld [vmem:[%s166_s0] sm:$0x1]  ;;  %44 = vst [vmem:[#allocation2] sm:$0x1] %v140_v2 }
   0x2   :  { %v46_v1 = vld [vmem:[%s167_s1] sm:$0x1] }
   0x3   :  { %v47_v3 = vsub.f32 %v45_v0, %v46_v1 }
   0x4   :  { %7 = vsyncpa [#allocation4], 0  ;;  %v57_v4 = vlaneseq  ;;  %vm73_vm1 = vcmask 1040384   ;;  %s105_s14 = sshll.u32 %s168_s2, 4  ;;  %s106_s14 = int_to_ptr.vmem [resolvable:$true] %s105_s14 }
   0x5   :  { %v48_v5 = vmul.f32 %v47_v3, %v47_v3  ;;  %s126_s17 = scalar_lea.vmem %s106_s14, 16  ;;  %p131_p1 = scmp.lt.s32.totalorder %s106_s14, %s106_s14 }
   0x6   :  { %v58_v7 = vand.u32 127, %v57_v4  ;;  %p127_p0 = scmp.ne.s32.totalorder %s106_s14, %s126_s17  ;;  %p132_p2 = scmp.lt.s32.totalorder %s126_s17, %s126_s17 }
   0x8   :  { %v49_v6 = vld [vmem:[#allocation2] sm:$0x1]  ;;  %v63_v9 = vand.u32 1, %v58_v7  ;;  %p133_p3 = por %p132_p2, %p131_p1 }
   0x9   :  { %v51_v8 = vadd.f32 %v49_v6, %v48_v5 }
   0xa   :  { %vm71_vm0 = vcmp.eq.s32.totalorder %v63_v9, 0  ;;  %p134_p4 = pnand %p133_p3, %p127_p0 }
   0xb   :  { %52 = vst [vmem:[#allocation2] sm:$0x1] %v51_v8 }
  0x12   :  { %v56_v10 = vld [vmem:[#allocation2] sm:$0x1] }
  0x13   :  { %v72_v11 = vsel %vm71_vm0, %v56_v10, 0.0  ;;  %v84_v13 = vsel %vm73_vm1, %v56_v10, 0.0 }
  0x14   :  { %v74_v12 = vsel %vm73_vm1, %v72_v11, 0.0 }
  0x15   :  { %75 = vadd.xlane.f32.xlu0 %v74_v12 }
  0x19   :  { %85 = vadd.xlane.f32.xlu0 %v84_v13 }
  0xa2   :  { %v76_v14 = vpop.xlane.xlu0 %75 }
  0xa3   :  { %v77_v15 = vrot.slane %v76_v14, 4 }
  0xa5   :  { %v78_v16 = vadd.f32 %v77_v15, %v76_v14 }
  0xa6   :  { %v86_v17 = vpop.xlane.xlu0 %85 }
  0xa7   :  { %v79_v18 = vrot.slane %v78_v16, 2  ;;  %v87_v19 = vrot.slane %v86_v17, 4 }
  0xa9   :  { %v88_v20 = vadd.f32 %v87_v19, %v86_v17  ;;  %v80_v21 = vadd.f32 %v79_v18, %v78_v16 }
  0xab   :  { %v89_v22 = vrot.slane %v88_v20, 2  ;;  %v81_v23 = vrot.slane %v80_v21, 1 }
  0xad   :  { %v90_v24 = vadd.f32 %v89_v22, %v88_v20  ;;  %v82_v25 = vadd.f32 %v81_v23, %v80_v21 }
  0xaf   :  { %120 = vpush %v82_v25  ;;  %v91_v26 = vrot.slane %v90_v24, 1 }
  0xb1   :  { %v92_v27 = vadd.f32 %v91_v26, %v90_v24 }
  0xb3   :  { %122 = vpush %v92_v27 }
  0xe0   :  { %s121_s0 = spop %120 }
  0xe1   :  { %95 = sst [smem:[#allocation3]] %s121_s0 }
  0xe4   :  { %s123_s15 = spop %122 }
  0xe5   :  { %s96_s16 = ssub.f32 %s123_s15, %s121_s0 }
  0xe7   :  { %98 = sst [smem:[#allocation3 + $0x1]] %s96_s16 }
  0xe8   :  { %137 = shalt.err (!%p134_p4)
}
  0xe9   :  { %s141_s18 = smov [#allocation3]  }
  0xea   :  { %108 = dma.smem_to_vmem %s141_s18, 16, %s106_s14, [#allocation4]  }
  0xeb   :  { %138 = dma.done.wait [#allocation4], 16  }
  0xec   :  { %139 = vsyncadd [#allocation4], 4294967280 }
  0xed   :  { %112 = sfence }
  0xee   :  { %113 = vsyncpa [#allocation4], 1 }

</bundles_post_ra>
